<compile_context>
chip_gen: v6e
topology: v6e:2x2x1
jax: 0.10.0
libtpu: 0.0.40
codegen_flags: <defaults>
</compile_context>

<pallas_src>
import functools

import jax
import jax.numpy as jnp
from jax.experimental import pallas as pl
from jax.experimental.pallas import tpu as pltpu

HIDDE_SIZE_OUT = 8  # fixed in the reference module


# ----------------------------------------------------------------------------
# Packed-parameter layout: one (R, C) f32 buffer, every segment 128-col aligned
# so in-kernel slices are lane-tile aligned.  Segment order:
#   w1 (H,2) | b1 (H,1) | w2 (H,H) | b2 (H,1) | w3 (8,H) | embed (8,DS)
#   | b3 (8,1) | wo (OUT,8) | bo (OUT,1)
# (all stored transposed, i.e. (out_features, in_features)).
# ----------------------------------------------------------------------------
def _packed_layout(hidde_size, discr_size):
    widths = (2, 1, hidde_size, 1, hidde_size, discr_size, 1, HIDDE_SIZE_OUT, 1)
    offs = []
    c = 0
    for w in widths:
        offs.append(c)
        c += 128 * pl.cdiv(w, 128)
    return tuple(offs), c


def pack_params(params, hidde_size, discr_size, out_size):
    """Pack all weights/biases into one contiguous (R, C) f32 buffer (transposed)."""
    H, DS, OUT = hidde_size, discr_size, out_size
    offs, cols = _packed_layout(H, DS)
    rows = 8 * pl.cdiv(max(H, HIDDE_SIZE_OUT, OUT), 8)
    buf = jnp.zeros((rows, cols), jnp.float32)

    segments = (
        params["w1"].T,     # (H, 2)
        params["b1"].T,     # (H, 1)
        params["w2"].T,     # (H, H)
        params["b2"].T,     # (H, 1)
        params["w3"].T,     # (8, H)
        params["embed"].T,  # (8, DS)
        params["b3"].T,     # (8, 1)
        params["wo"].T,     # (OUT, 8)
        params["bo"].T,     # (OUT, 1)
    )
    for arr, off in zip(segments, offs):
        r, c = arr.shape
        buf = buf.at[0:r, off:off + c].set(arr.astype(jnp.float32))
    return buf


# ----------------------------------------------------------------------------
# Kernel (transposed layout: batch on lanes)
# ----------------------------------------------------------------------------
def _actor_net_kernel(xT_ref, pk_ref, out_ref, *, H, DS, OUT, offs):
    """One batch tile of the fused ActorNet forward.

    xT_ref : (3, TB)  f32   state^T  (rows 0:2 continuous, row 2 discrete idx)
    pk_ref : (R, C)   f32   packed weights (resident, constant index_map)
    out_ref: (OUT, TB) f32  softmax probabilities (over rows)
    """
    TB = xT_ref.shape[1]

    xb = xT_ref[...]                          # (3, TB)
    x0 = xb[0:1, :]                           # (1, TB)
    x1 = xb[1:2, :]                           # (1, TB)
    discr = xb[2:3, :].astype(jnp.int32)      # (1, TB)  trunc-toward-zero == .long()

    o_w1, o_b1, o_w2, o_b2, o_w3, o_emb, o_b3, o_wo, o_bo = offs
    w1 = pk_ref[0:H, o_w1:o_w1 + 2]                           # (H, 2)
    b1 = pk_ref[0:H, o_b1:o_b1 + 1]                           # (H, 1)
    w2 = pk_ref[0:H, o_w2:o_w2 + H]                           # (H, H)
    b2 = pk_ref[0:H, o_b2:o_b2 + 1]                           # (H, 1)
    w3 = pk_ref[0:HIDDE_SIZE_OUT, o_w3:o_w3 + H]              # (8, H)
    emb = pk_ref[0:HIDDE_SIZE_OUT, o_emb:o_emb + DS]          # (8, DS)
    b3 = pk_ref[0:HIDDE_SIZE_OUT, o_b3:o_b3 + 1]              # (8, 1)
    wo = pk_ref[0:OUT, o_wo:o_wo + HIDDE_SIZE_OUT]            # (OUT, 8)
    bo = pk_ref[0:OUT, o_bo:o_bo + 1]                         # (OUT, 1)

    # ---- layer 1: K=2 contraction as two VPU broadcast FMAs (keep MXU free) ----
    h = w1[:, 0:1] * x0 + w1[:, 1:2] * x1 + b1                # (H, TB)
    h = jnp.maximum(h, 0.0)

    # ---- layer 2 on the MXU ----
    h = jnp.dot(w2, h, preferred_element_type=jnp.float32) + b2
    h = jnp.maximum(h, 0.0)                                   # (H, TB)

    # ---- layer 3 + embedding lookup (one-hot matmul), accumulated together ----
    ids = jax.lax.broadcasted_iota(jnp.int32, (DS, TB), 0)
    one_hot = (ids == discr).astype(jnp.float32)              # (DS, TB)
    hid = (jnp.dot(w3, h, preferred_element_type=jnp.float32)
           + jnp.dot(emb, one_hot, preferred_element_type=jnp.float32)
           + b3)                                              # (8, TB)

    # ---- output layer + softmax over the class axis (rows) ----
    logits = jnp.dot(wo, hid, preferred_element_type=jnp.float32) + bo  # (OUT, TB)
    m = jnp.max(logits, axis=0, keepdims=True)
    e = jnp.exp(logits - m)
    denom = jnp.sum(e, axis=0, keepdims=True)
    r = pl.reciprocal(denom, approx=True)                     # EUP slot
    r = r * (2.0 - denom * r)                                 # one Newton step -> f32 accuracy
    out_ref[...] = e * r                                      # lane-dense unmasked store


# ----------------------------------------------------------------------------
# Wrapper
# ----------------------------------------------------------------------------
@functools.partial(jax.jit,
                   static_argnames=("out_size", "hidde_size", "discr_size", "tile_b"))
def actor_net_forward(x, packed, *, out_size, hidde_size, discr_size, tile_b=4096):
    """x: (B, 3) float32 (2 continuous features + float-encoded discrete index)."""
    assert tile_b % 128 == 0, "batch tile must be a multiple of 128 lanes"
    B, S = x.shape
    H, DS, OUT = hidde_size, discr_size, out_size
    offs, cols = _packed_layout(H, DS)
    assert packed.shape[1] == cols

    # batch tile: multiple of 128 lanes; whole (padded) batch if it is small
    TB = min(tile_b, 128 * pl.cdiv(B, 128))
    grid_b = pl.cdiv(B, TB)
    B_pad = grid_b * TB

    xT = x.T.astype(jnp.float32)              # (3, B)  batch on the lane axis
    if B_pad != B:
        # padded rows: conti = 0, discrete index = 0 (valid) -> finite, sliced off below
        xT = jnp.pad(xT, ((0, 0), (0, B_pad - B)))

    kernel = functools.partial(_actor_net_kernel, H=H, DS=DS, OUT=OUT, offs=offs)
    outT = pl.pallas_call(
        kernel,
        out_shape=jax.ShapeDtypeStruct((OUT, B_pad), jnp.float32),
        grid=(grid_b,),
        in_specs=[
            pl.BlockSpec((S, TB), lambda i: (0, i)),          # x tile, pipelined
            pl.BlockSpec(packed.shape, lambda i: (0, 0)),     # weights resident (1 DMA)
        ],
        out_specs=pl.BlockSpec((OUT, TB), lambda i: (0, i)),  # lane-dense store
        compiler_params=pltpu.CompilerParams(
            dimension_semantics=("parallel",)),               # v7x: shard tiles over 2 TCs
    )(xT, packed)

    return outT[:, :B].T                                       # back to (B, OUT)


# ----------------------------------------------------------------------------
# Parameters & pure-JAX reference
# ----------------------------------------------------------------------------
def init_params(key, state_size, out_size, hidde_size, discr_size):
    """Deterministic synthetic parameters matching ActorNet.__init__ shapes."""
    assert state_size - 1 == 2, "reference module slices exactly 2 continuous features"
    ks = jax.random.split(key, 6)
    h = hidde_size
    scale = 0.1
    return {
        # self.layers = make_seq(state_size - 1, hidde_size_out, hidde_size)
        "w1": scale * jax.random.normal(ks[0], (2, h), jnp.float32),
        "b1": jnp.zeros((1, h), jnp.float32),
        "w2": scale * jax.random.normal(ks[1], (h, h), jnp.float32),
        "b2": jnp.zeros((1, h), jnp.float32),
        "w3": scale * jax.random.normal(ks[2], (h, HIDDE_SIZE_OUT), jnp.float32),
        "b3": jnp.zeros((1, HIDDE_SIZE_OUT), jnp.float32),
        # self.embed_layer = nn.Embedding(discr_size, hidde_size_out)
        "embed": scale * jax.random.normal(ks[3], (discr_size, HIDDE_SIZE_OUT), jnp.float32),
        # self.output_layer = nn.Linear(hidde_size_out, out_size)
        "wo": scale * jax.random.normal(ks[4], (HIDDE_SIZE_OUT, out_size), jnp.float32),
        "bo": scale * jax.random.normal(ks[5], (1, out_size), jnp.float32),
    }


def reference_forward(x, params):
    """Pure-JAX reference (mirrors the PyTorch forward)."""
    conti = x[:, 0:2]
    discr = x[:, 2].astype(jnp.int32)
    h = jnp.maximum(conti @ params["w1"] + params["b1"], 0.0)
    h = jnp.maximum(h @ params["w2"] + params["b2"], 0.0)
    hc = h @ params["w3"] + params["b3"]
    hd = params["embed"][discr]
    logits = (hc + hd) @ params["wo"] + params["bo"]
    return jax.nn.softmax(logits, axis=1)


if __name__ == "__main__":
    key = jax.random.PRNGKey(0)
    k_param, k_conti, k_discr = jax.random.split(key, 3)

    batch = 8
    state_size = 3       # 2 continuous features + 1 discrete index
    out_size = 4
    hidde_size = 32
    discr_size = 16

    params = init_params(k_param, state_size, out_size, hidde_size, discr_size)
    packed = pack_params(params, hidde_size, discr_size, out_size)

    conti_part = jax.random.normal(k_conti, (batch, 2), jnp.float32)
    discr_part = jax.random.randint(k_discr, (batch, 1), 0, discr_size).astype(jnp.float32)
    x = jnp.concatenate([conti_part, discr_part], axis=1)   # (B, 3)

    out = actor_net_forward(x, packed, out_size=out_size, hidde_size=hidde_size,
                            discr_size=discr_size, tile_b=4096)
    out = jax.block_until_ready(out)

    ref = reference_forward(x, params)
    assert out.shape == (batch, out_size)
    assert jnp.allclose(jnp.sum(out, axis=1), 1.0, atol=1e-5)
    assert jnp.allclose(out, ref, atol=1e-5, rtol=1e-5)

    # second check: ragged batch spanning multiple tiles (exercises grid + padding)
    k2a, k2b = jax.random.split(jax.random.PRNGKey(1))
    batch2 = 300
    x2 = jnp.concatenate(
        [jax.random.normal(k2a, (batch2, 2), jnp.float32),
         jax.random.randint(k2b, (batch2, 1), 0, discr_size).astype(jnp.float32)],
        axis=1)
    out2 = jax.block_until_ready(
        actor_net_forward(x2, packed, out_size=out_size, hidde_size=hidde_size,
                          discr_size=discr_size, tile_b=128))
    ref2 = reference_forward(x2, params)
    assert out2.shape == (batch2, out_size)
    assert jnp.allclose(out2, ref2, atol=1e-5, rtol=1e-5)

    print("KERNEL_OK")
</pallas_src>

<mosaic_0001>
module attributes {stable_mosaic.version = 11 : i64} {
  func.func @_actor_net_kernel(%arg0: i32, %arg1: memref<3x128xf32, #tpu.memory_space<vmem>>, %arg2: memref<32x1152xf32, #tpu.memory_space<vmem>>, %arg3: memref<4x128xf32, #tpu.memory_space<vmem>>) attributes {dimension_semantics = [#tpu.dimension_semantics<parallel>], iteration_bounds = array<i64: 1>, scalar_prefetch = 0 : i64, scratch_operands = 0 : i64, tpu.core_type = #tpu.core_type<tc>, window_params = [{transform_indices = @transform_0, window_bounds = array<i64: 3, 128>}, {pipeline_mode = #tpu.pipeline_mode<synchronous>, transform_indices = @transform_1, window_bounds = array<i64: 32, 1152>}, {transform_indices = @transform_2, window_bounds = array<i64: 4, 128>}]} {
    %c0 = arith.constant 0 : index
    %c0_0 = arith.constant 0 : index
    %0 = vector.load %arg1[%c0, %c0_0] : memref<3x128xf32, #tpu.memory_space<vmem>>, vector<3x128xf32>
    %1 = vector.extract_strided_slice %0 {offsets = [0, 0], sizes = [1, 128], strides = [1, 1]} : vector<3x128xf32> to vector<1x128xf32>
    %2 = vector.extract_strided_slice %0 {offsets = [1, 0], sizes = [1, 128], strides = [1, 1]} : vector<3x128xf32> to vector<1x128xf32>
    %3 = vector.extract_strided_slice %0 {offsets = [2, 0], sizes = [1, 128], strides = [1, 1]} : vector<3x128xf32> to vector<1x128xf32>
    %4 = arith.fptosi %3 : vector<1x128xf32> to vector<1x128xi32>
    %c0_1 = arith.constant 0 : index
    %c0_2 = arith.constant 0 : index
    %5 = vector.load %arg2[%c0_1, %c0_2] : memref<32x1152xf32, #tpu.memory_space<vmem>>, vector<32x2xf32>
    %c0_3 = arith.constant 0 : index
    %c128 = arith.constant 128 : index
    %6 = vector.load %arg2[%c0_3, %c128] : memref<32x1152xf32, #tpu.memory_space<vmem>>, vector<32x1xf32>
    %c0_4 = arith.constant 0 : index
    %c256 = arith.constant 256 : index
    %7 = vector.load %arg2[%c0_4, %c256] : memref<32x1152xf32, #tpu.memory_space<vmem>>, vector<32x32xf32>
    %c0_5 = arith.constant 0 : index
    %c384 = arith.constant 384 : index
    %8 = vector.load %arg2[%c0_5, %c384] : memref<32x1152xf32, #tpu.memory_space<vmem>>, vector<32x1xf32>
    %c0_6 = arith.constant 0 : index
    %c512 = arith.constant 512 : index
    %9 = vector.load %arg2[%c0_6, %c512] : memref<32x1152xf32, #tpu.memory_space<vmem>>, vector<8x32xf32>
    %c0_7 = arith.constant 0 : index
    %c640 = arith.constant 640 : index
    %10 = vector.load %arg2[%c0_7, %c640] : memref<32x1152xf32, #tpu.memory_space<vmem>>, vector<8x16xf32>
    %c0_8 = arith.constant 0 : index
    %c768 = arith.constant 768 : index
    %11 = vector.load %arg2[%c0_8, %c768] : memref<32x1152xf32, #tpu.memory_space<vmem>>, vector<8x1xf32>
    %c0_9 = arith.constant 0 : index
    %c896 = arith.constant 896 : index
    %12 = vector.load %arg2[%c0_9, %c896] : memref<32x1152xf32, #tpu.memory_space<vmem>>, vector<4x8xf32>
    %c0_10 = arith.constant 0 : index
    %c1024 = arith.constant 1024 : index
    %13 = vector.load %arg2[%c0_10, %c1024] : memref<32x1152xf32, #tpu.memory_space<vmem>>, vector<4x1xf32>
    %14 = vector.extract_strided_slice %5 {offsets = [0, 0], sizes = [32, 1], strides = [1, 1]} : vector<32x2xf32> to vector<32x1xf32>
    %15 = vector.broadcast %14 : vector<32x1xf32> to vector<32x128xf32>
    %16 = vector.broadcast %1 : vector<1x128xf32> to vector<32x128xf32>
    %17 = arith.mulf %15, %16 : vector<32x128xf32>
    %18 = vector.extract_strided_slice %5 {offsets = [0, 1], sizes = [32, 1], strides = [1, 1]} : vector<32x2xf32> to vector<32x1xf32>
    %19 = vector.broadcast %18 : vector<32x1xf32> to vector<32x128xf32>
    %20 = vector.broadcast %2 : vector<1x128xf32> to vector<32x128xf32>
    %21 = arith.mulf %19, %20 : vector<32x128xf32>
    %22 = arith.addf %17, %21 : vector<32x128xf32>
    %23 = vector.broadcast %6 : vector<32x1xf32> to vector<32x128xf32>
    %24 = arith.addf %22, %23 : vector<32x128xf32>
    %cst = arith.constant 0.000000e+00 : f32
    %25 = vector.broadcast %cst : f32 to vector<32x128xf32>
    %26 = arith.maximumf %24, %25 : vector<32x128xf32>
    %cst_11 = arith.constant dense<0.000000e+00> : vector<32x128xf32>
    %27 = tpu.matmul %7, %26, %cst_11 {dimension_numbers = #tpu.dot_dimension_numbers<[1], [0], [0], [1], [0, 0, 1, 1], [], []>} : vector<32x32xf32>, vector<32x128xf32>, vector<32x128xf32> -> vector<32x128xf32>
    %28 = vector.broadcast %8 : vector<32x1xf32> to vector<32x128xf32>
    %29 = arith.addf %27, %28 : vector<32x128xf32>
    %cst_12 = arith.constant 0.000000e+00 : f32
    %30 = vector.broadcast %cst_12 : f32 to vector<32x128xf32>
    %31 = arith.maximumf %29, %30 : vector<32x128xf32>
    %32 = tpu.iota {dimensions = array<i32: 0>} : vector<16x128xi32>
    %33 = vector.broadcast %4 : vector<1x128xi32> to vector<16x128xi32>
    %34 = arith.cmpi eq, %32, %33 : vector<16x128xi32>
    %35 = arith.extui %34 : vector<16x128xi1> to vector<16x128xi32>
    %36 = arith.sitofp %35 : vector<16x128xi32> to vector<16x128xf32>
    %cst_13 = arith.constant dense<0.000000e+00> : vector<8x128xf32>
    %37 = tpu.matmul %9, %31, %cst_13 {dimension_numbers = #tpu.dot_dimension_numbers<[1], [0], [0], [1], [0, 0, 1, 1], [], []>} : vector<8x32xf32>, vector<32x128xf32>, vector<8x128xf32> -> vector<8x128xf32>
    %cst_14 = arith.constant dense<0.000000e+00> : vector<8x128xf32>
    %38 = tpu.matmul %10, %36, %cst_14 {dimension_numbers = #tpu.dot_dimension_numbers<[1], [0], [0], [1], [0, 0, 1, 1], [], []>} : vector<8x16xf32>, vector<16x128xf32>, vector<8x128xf32> -> vector<8x128xf32>
    %39 = arith.addf %37, %38 : vector<8x128xf32>
    %40 = vector.broadcast %11 : vector<8x1xf32> to vector<8x128xf32>
    %41 = arith.addf %39, %40 : vector<8x128xf32>
    %cst_15 = arith.constant dense<0.000000e+00> : vector<4x128xf32>
    %42 = tpu.matmul %12, %41, %cst_15 {dimension_numbers = #tpu.dot_dimension_numbers<[1], [0], [0], [1], [0, 0, 1, 1], [], []>} : vector<4x8xf32>, vector<8x128xf32>, vector<4x128xf32> -> vector<4x128xf32>
    %43 = vector.broadcast %13 : vector<4x1xf32> to vector<4x128xf32>
    %44 = arith.addf %42, %43 : vector<4x128xf32>
    %cst_16 = arith.constant dense<0xFF800000> : vector<128xf32>
    %45 = vector.multi_reduction <maximumf>, %44, %cst_16 [0] : vector<4x128xf32> to vector<128xf32>
    %46 = vector.shape_cast %45 : vector<128xf32> to vector<1x128xf32>
    %47 = vector.broadcast %46 : vector<1x128xf32> to vector<4x128xf32>
    %48 = arith.subf %44, %47 : vector<4x128xf32>
    %49 = math.exp %48 : vector<4x128xf32>
    %cst_17 = arith.constant dense<0.000000e+00> : vector<128xf32>
    %50 = vector.multi_reduction <add>, %49, %cst_17 [0] : vector<4x128xf32> to vector<128xf32>
    %51 = vector.shape_cast %50 : vector<128xf32> to vector<1x128xf32>
    %52 = tpu.reciprocal %51 {approx = true} : vector<1x128xf32> -> vector<1x128xf32>
    %53 = arith.mulf %51, %52 : vector<1x128xf32>
    %cst_18 = arith.constant 2.000000e+00 : f32
    %54 = vector.broadcast %cst_18 : f32 to vector<1x128xf32>
    %55 = arith.subf %54, %53 : vector<1x128xf32>
    %56 = arith.mulf %52, %55 : vector<1x128xf32>
    %57 = vector.broadcast %56 : vector<1x128xf32> to vector<4x128xf32>
    %58 = arith.mulf %49, %57 : vector<4x128xf32>
    %c0_19 = arith.constant 0 : index
    %c0_20 = arith.constant 0 : index
    %59 = vector.load %arg3[%c0_19, %c0_20] : memref<4x128xf32, #tpu.memory_space<vmem>>, vector<4x128xf32>
    tpu.vector_store %arg3[%c0_19, %c0_20], %58 {strides = array<i32>} : memref<4x128xf32, #tpu.memory_space<vmem>>, vector<4x128xf32>,
    return
  }
  func.func @transform_0(%arg0: i32) -> (i32, i32) {
    %c0_i32 = arith.constant 0 : i32
    %c0_i32_0 = arith.constant 0 : i32
    return %c0_i32, %arg0 : i32, i32
  }
  func.func @transform_1(%arg0: i32) -> (i32, i32) {
    %c0_i32 = arith.constant 0 : i32
    %c0_i32_0 = arith.constant 0 : i32
    %c0_i32_1 = arith.constant 0 : i32
    return %c0_i32, %c0_i32_0 : i32, i32
  }
  func.func @transform_2(%arg0: i32) -> (i32, i32) {
    %c0_i32 = arith.constant 0 : i32
    %c0_i32_0 = arith.constant 0 : i32
    return %c0_i32, %arg0 : i32, i32
  }
}

</mosaic_0001>

<bundles_post_ra>
// kernel: actor_net_forward.1
= control target key start
LH: loop header
LB: loop body
LE: loop exit
PB: predicated region body
PF: predicated region fallthrough
CT: control target
= control target key end

     0   :  { %7 = vsyncpa [#allocation3], 0  ;;  %s637_s9 = smov [#allocation2]   ;;  %s681_s0 = inlined_call_operand.vmem [shape: f32[3,128], index: 0, kind: input, shape index: {}]   ;;  %s682_s1 = inlined_call_operand.hbm [shape: f32[32,1152], index: 1, kind: input, shape index: {}]   ;;  %s683_s2 = inlined_call_operand.vmem [shape: f32[4,128], index: 2, kind: output, shape index: {}]  }
   0x1   :  { %s15_s10 = sshll.u32 %s637_s9, 4  ;;  %s16_s10 = int_to_ptr.vmem [resolvable:$true] %s15_s10 }
   0x2   :  { %s623_s11 = scalar_lea.vmem %s16_s10, 4608  ;;  %p628_p1 = scmp.lt.s32.totalorder %s16_s10, %s16_s10 }
   0x3   :  { %p624_p0 = scmp.ne.s32.totalorder %s16_s10, %s623_s11  ;;  %p629_p2 = scmp.lt.s32.totalorder %s623_s11, %s623_s11 }
   0x5   :  { %p630_p3 = por %p629_p2, %p628_p1 }
   0x7   :  { %p631_p4 = pnand %p630_p3, %p624_p0 }
   0x9   :  { %634 = shalt.err (!%p631_p4)
}
   0xa   :  { %s638_s12 = smov 1152   ;;  %s639_s13 = smov 72  }
   0xb   :  { %21 = dma.hbm_to_vmem [thread:$0]  %s682_s1, 4608, %s16_s10, [#allocation3], %s638_s12, %s638_s12, %s639_s13  }
   0xc   :  { %635 = dma.done.wait [#allocation3], 4608  }
   0xd   :  { %636 = vsyncadd [#allocation3], 4294962688  ;;  %v640_v0 = vmov 1   ;;  %v641_v1 = vmov 0   ;;  %v30_v2 = vld [vmem:[#allocation2 + $0xd8] sm:$0xff]  ;;  %v29_v3 = vld [vmem:[#allocation2 + $0x90] sm:$0xff]  ;;  %v68_v17 = vlaneseq }
   0xe   :  { %604 = vset.pattern.permute.xlu0 %v640_v0  ;;  %605 = vset.pattern.permute.xlu1 %v641_v1  ;;  %v28_v4 = vld [vmem:[#allocation2 + $0x48] sm:$0xff]  ;;  %v27_v5 = vld [vmem:[#allocation2] sm:$0xff]  ;;  %v32_v7 = vld [vmem:[#allocation2 + $0x50] sm:$0xff]  ;;  %vm152_vm0 = vcmask 261120   ;;  %vm644_vm3 = vmmov 0   ;;  %vm267_vm4 = vcmask 130048  }
   0xf   :  { %89 = vperm.xlu0 %604, %v30_v2   ;;  %60 = vperm.xlu1 %605, %v29_v3   ;;  %v34_v6 = vld [vmem:[#allocation2 + $0xe0] sm:$0xff]  ;;  %v42_v8 = vld [vmem:[#allocation2 + $0xf0] sm:$0xff]  ;;  %v33_v9 = vld [vmem:[#allocation2 + $0x98] sm:$0xff]  ;;  %v664_v18 = vshrl.u32 %v68_v17, 7  ;;  %vm425_vm5 = vcmask 64512   ;;  %vm499_vm6 = vcmask 1043456  }
  0x10   :  { %v40_v10 = vld [vmem:[#allocation2 + $0x60] sm:$0xff]  ;;  %v31_v11 = vld [vmem:[#allocation2 + $0x8] sm:$0xff]  ;;  %v45_v12 = vld [vmem:[#allocation2 + $0x30] sm:$0xff] }
  0x11   :  { %v35_v13 = vld [vmem:[#allocation2 + $0x10] sm:$0xff]  ;;  %v41_v14 = vld [vmem:[#allocation2 + $0xa8] sm:$0xff]  ;;  %v39_v15 = vld [vmem:[#allocation2 + $0x18] sm:$0xff]  ;;  %v94_v21 = vsub.s32 1, %v664_v18  ;;  %v70_v22 = vsub.s32 0, %v664_v18  ;;  %v259_v61 = vsub.s32 2, %v664_v18 }
  0x12   :  { %565 = vmatprep.mubr.msk.f32.mxu0 %vm152_vm0, %v35_v13  ;;  %v47_v16 = vld [vmem:[#allocation2 + $0x40] sm:$0xf]  ;;  %v36_v56 = vld [vmem:[#allocation2 + $0x58] sm:$0xff]  ;;  %v38_v58 = vld [vmem:[#allocation2 + $0xe8] sm:$0xff]  ;;  %v256_v62 = vadd.s32 8, %v664_v18 }
  0x13   :  { %606 = vset.pattern.permute.xlu1 %v640_v0  ;;  %81 = vperm.xlu0 %604, %v28_v4   ;;  %v25_v24 = vld [vmem:[%s681_s0] sm:$0x7] }
  0x14   :  { %85 = vperm.xlu1 %606, %v29_v3   ;;  %v95_v26 = vrot.slane %v25_v24, %v94_v21  ;;  %v71_v27 = vrot.slane %v25_v24, %v70_v22  ;;  %v37_v57 = vld [vmem:[#allocation2 + $0xa0] sm:$0xff]  ;;  %v594_v59 = vtrunc.f32 %v25_v24 }
  0x16   :  { %v595_v60 = vcvt.f32.s32 %v594_v59 }
  0x17   :  { %608 = vset.pattern.permute.xlu0 %v641_v1 }
  0x18   :  { %607 = vset.pattern.permute.xlu1 %v641_v1  ;;  %65 = vperm.xlu0 %608, %v30_v2   ;;  %v260_v63 = vrot.slane %v595_v60, %v259_v61  ;;  %v44_v2 = vld [vmem:[#allocation2 + $0x28] sm:$0xff] }
  0x19   :  { %55 = vperm.xlu1 %607, %v28_v4  }
  0x1a   :  { %vm262_vm1 = vcmp.eq.s32.totalorder %v256_v62, %v260_v63  ;;  %vm261_vm2 = vcmp.eq.s32.totalorder %v664_v18, %v260_v63 }
  0x1c   :  { %50 = vperm.xlu0 %608, %v27_v5  }
  0x1d   :  { %121 = vperm.xlu1 %607, %v34_v6  }
  0x20   :  { %111 = vperm.xlu0 %608, %v32_v7  }
  0x21   :  { %609 = vset.pattern.permute.xlu1 %v640_v0  ;;  %v642_v0 = vmov 0.0  }
  0x22   :  { %77 = vperm.xlu1 %609, %v27_v5   ;;  %571 = vmatprep.subr.mxu1 %v642_v0 }
  0x23   :  { %575 = vmatprep.mubr.msk.f32.mxu1 %vm644_vm3, %v642_v0 }
  0x24   :  { %149 = vperm.xlu0 %608, %v42_v8  }
  0x26   :  { %610 = vset.pattern.permute.xlu1 %v641_v1  ;;  %v643_v1 = vmov 1.0  }
  0x27   :  { %116 = vperm.xlu1 %610, %v33_v9   ;;  %572 = vmatpush3.msk.msra.mxu1 %vm262_vm1, %v643_v1 }
  0x28   :  { %139 = vperm.xlu0 %608, %v40_v10   ;;  %573 = vmatprep.subr.mxu1 %v642_v0 }
  0x29   :  { %574 = vmatpush3.msk.msra.mxu1 %vm261_vm2, %v643_v1 }
  0x2a   :  { %576 = vmatmul.mubr.msk.f32.vlgmr.msra.gmra.mxu1 %vm267_vm4, %v44_v2  ;;  %578 = vmatprep.subr.mxu1 %v642_v0 }
  0x2b   :  { %106 = vperm.xlu1 %610, %v31_v11   ;;  %586 = vmatprep.mubr.msk.f32.mxu1 %vm644_vm3, %v642_v0 }
  0x2c   :  { %416 = vperm.xlu0 %608, %v45_v12  }
  0x2f   :  { %144 = vperm.xlu1 %610, %v41_v14  }
  0x33   :  { %134 = vperm.xlu1 %610, %v39_v15  }
  0x37   :  { %422 = vperm.xlu1 %610, %v47_v16  }
  0x8a   :  { %v61_v19 = vpop.permute.xlu1 %60  ;;  %v90_v20 = vpop.permute.xlu0 %89 }
  0x8b   :  { %v99_v28 = vmul.f32 %v95_v26, %v90_v20  ;;  %v74_v41 = vmul.f32 %v71_v27, %v61_v19  ;;  %v43_v19 = vld [vmem:[#allocation2 + $0x20] sm:$0xff] }
  0x8e   :  { %v82_v23 = vpop.permute.xlu0 %81 }
  0x8f   :  { %v86_v25 = vpop.permute.xlu1 %85  ;;  %v97_v38 = vmul.f32 %v95_v26, %v82_v23 }
  0x90   :  { %v98_v37 = vmul.f32 %v95_v26, %v86_v25 }
  0x92   :  { %v102_v46 = vadd.f32 %v98_v37, %v74_v41 }
  0x93   :  { %v66_v29 = vpop.permute.xlu0 %65 }
  0x94   :  { %v75_v30 = vmul.f32 %v71_v27, %v66_v29  ;;  %v56_v31 = vpop.permute.xlu1 %55 }
  0x95   :  { %v73_v39 = vmul.f32 %v71_v27, %v56_v31 }
  0x96   :  { %v103_v32 = vadd.f32 %v99_v28, %v75_v30 }
  0x97   :  { %v51_v35 = vpop.permute.xlu0 %50  ;;  %v101_v44 = vadd.f32 %v97_v38, %v73_v39 }
  0x98   :  { %v122_v33 = vpop.permute.xlu1 %121  ;;  %v72_v43 = vmul.f32 %v71_v27, %v51_v35  ;;  %v46_v27 = vld [vmem:[#allocation2 + $0x38] sm:$0xf] }
  0x99   :  { %v127_v34 = vadd.f32 %v122_v33, %v103_v32 }
  0x9b   :  { %v131_v36 = vmax.f32 %v127_v34, 0.0  ;;  %v112_v42 = vpop.permute.xlu0 %111 }
  0x9c   :  { %v125_v48 = vadd.f32 %v112_v42, %v101_v44 }
  0x9d   :  { %v78_v40 = vpop.permute.xlu1 %77  ;;  %557 = vmatprep.subr.mxu0 %v131_v36 }
  0x9e   :  { %558 = vmatpush3.msra.mxu0 %v131_v36  ;;  %v96_v45 = vmul.f32 %v95_v26, %v78_v40  ;;  %v129_v53 = vmax.f32 %v125_v48, 0.0 }
  0x9f   :  { %v150_v3 = vpop.permute.xlu0 %149 }
  0xa0   :  { %v100_v51 = vadd.f32 %v96_v45, %v72_v43 }
  0xa2   :  { %v117_v47 = vpop.permute.xlu1 %116 }
  0xa3   :  { %v126_v49 = vadd.f32 %v117_v47, %v102_v46  ;;  %v140_v9 = vpop.permute.xlu0 %139 }
  0xa5   :  { %v130_v50 = vmax.f32 %v126_v49, 0.0 }
  0xa6   :  { %v107_v52 = vpop.permute.xlu1 %106 }
  0xa7   :  { %v124_v54 = vadd.f32 %v107_v52, %v100_v51  ;;  %559 = vmatprep.subr.mxu0 %v130_v50  ;;  %v417_v24 = vpop.permute.xlu0 %416 }
  0xa8   :  { %560 = vmatpush3.msra.mxu0 %v130_v50 }
  0xa9   :  { %v128_v55 = vmax.f32 %v124_v54, 0.0  ;;  %561 = vmatprep.subr.mxu0 %v129_v53 }
  0xaa   :  { %562 = vmatpush3.msra.mxu0 %v129_v53  ;;  %v145_v5 = vpop.permute.xlu1 %144 }
  0xab   :  { %563 = vmatprep.subr.mxu0 %v128_v55 }
  0xac   :  { %564 = vmatpush3.msra.mxu0 %v128_v55 }
  0xad   :  { %566 = vmatmul.mubr.msk.f32.vlgmr.msra.gmra.mxu0 %vm152_vm0, %v36_v56  ;;  %589 = vmatprep.subr.mxu0 %v642_v0 }
  0xae   :  { %568 = vmatprep.mubr.msk.f32.mxu0 %vm152_vm0, %v37_v57  ;;  %v135_v14 = vpop.permute.xlu1 %134 }
  0xb1   :  { %569 = vmatmul.mubr.msk.f32.gmra.mxu0 %vm152_vm0, %v38_v58 }
  0xb2   :  { %591 = vmatprep.mubr.msk.f32.mxu0 %vm644_vm3, %v642_v0  ;;  %v423_v28 = vpop.permute.xlu1 %422 }
  0xea   :  { %v337_v20 = vpop.f32.mrf.mxu1 }
  0xec   :  { %v577_v21 = vpop.f32.mrf.mxu1 }
 0x16d   :  { %v567_v4 = vpop.f32.mrf.mxu0 }
 0x16e   :  { %v237_v11 = vadd.f32 %v567_v4, %v140_v9 }
 0x16f   :  { %v231_v6 = vpop.f32.mrf.mxu0 }
 0x170   :  { %v232_v15 = vadd.f32 %v231_v6, %v135_v14  ;;  %v251_v17 = vmax.f32 %v237_v11, 0.0 }
 0x171   :  { %v570_v7 = vpop.f32.mrf.mxu0 }
 0x172   :  { %v247_v8 = vadd.f32 %v570_v7, %v150_v3  ;;  %v250_v18 = vmax.f32 %v232_v15, 0.0 }
 0x173   :  { %v241_v10 = vpop.f32.mrf.mxu0 }
 0x174   :  { %v253_v12 = vmax.f32 %v247_v8, 0.0  ;;  %v242_v13 = vadd.f32 %v241_v10, %v145_v5 }
 0x176   :  { %v252_v16 = vmax.f32 %v242_v13, 0.0  ;;  %579 = vmatpush3.msra.mxu1 %v253_v12 }
 0x177   :  { %580 = vmatprep.subr.mxu1 %v642_v0 }
 0x178   :  { %581 = vmatpush3.msra.mxu1 %v252_v16 }
 0x179   :  { %582 = vmatprep.subr.mxu1 %v642_v0 }
 0x17a   :  { %583 = vmatpush3.msra.mxu1 %v251_v17 }
 0x17b   :  { %584 = vmatprep.subr.mxu1 %v642_v0 }
 0x17c   :  { %585 = vmatpush3.msra.mxu1 %v250_v18 }
 0x17d   :  { %587 = vmatmul.mubr.msk.f32.vlgmr.msra.gmra.mxu1 %vm152_vm0, %v43_v19 }
 0x23d   :  { %v410_v22 = vpop.f32.mrf.mxu1 }
 0x23e   :  { %v411_v23 = vadd.f32 %v410_v22, %v337_v20 }
 0x23f   :  { %v588_v25 = vpop.f32.mrf.mxu1 }
 0x240   :  { %v419_v26 = vadd.f32 %v417_v24, %v411_v23 }
 0x242   :  { %590 = vmatpush3.msra.mxu0 %v419_v26 }
 0x243   :  { %592 = vmatmul.mubr.msk.f32.vlgmr.msra.gmra.mxu0 %vm425_vm5, %v46_v27 }
 0x303   :  { %v495_v29 = vpop.f32.mrf.mxu0 }
 0x304   :  { %v496_v30 = vadd.f32 %v495_v29, %v423_v28 }
 0x305   :  { %v593_v31 = vpop.f32.mrf.mxu0 }
 0x306   :  { %v500_v32 = vsel %vm499_vm6, %v496_v30, -inf }
 0x307   :  { %v501_v33 = vrot.slane %v500_v32, 4 }
 0x309   :  { %v502_v34 = vmax.f32 %v500_v32, %v501_v33 }
 0x30b   :  { %v503_v35 = vrot.slane %v502_v34, 2 }
 0x30d   :  { %v504_v36 = vmax.f32 %v502_v34, %v503_v35 }
 0x30f   :  { %v505_v37 = vrot.slane %v504_v36, 1 }
 0x311   :  { %v506_v38 = vmax.f32 %v504_v36, %v505_v37 }
 0x313   :  { %v507_v39 = vsub.f32 %v496_v30, %v506_v38 }
 0x315   :  { %v508_v40 = vmul.f32 1.442695, %v507_v39 }
 0x317   :  { %611 = vpow2.f32 %v508_v40 }
 0x324   :  { %v612_v41 = vpop.eup %611 }
 0x325   :  { %v510_v42 = vsel %vm499_vm6, %v612_v41, 0.0 }
 0x326   :  { %v511_v43 = vrot.slane %v510_v42, 4 }
 0x328   :  { %v512_v44 = vadd.f32 %v511_v43, %v510_v42 }
 0x32a   :  { %v513_v45 = vrot.slane %v512_v44, 2 }
 0x32c   :  { %v514_v46 = vadd.f32 %v513_v45, %v512_v44 }
 0x32e   :  { %v515_v47 = vrot.slane %v514_v46, 1 }
 0x330   :  { %v516_v48 = vadd.f32 %v515_v47, %v514_v46 }
 0x332   :  { %613 = vrcp.f32 %v516_v48 }
 0x33f   :  { %v614_v49 = vpop.eup %613 }
 0x340   :  { %v518_v50 = vmul.f32 %v614_v49, %v516_v48 }
 0x342   :  { %v519_v51 = vsub.f32 2.0, %v518_v50 }
 0x344   :  { %v520_v52 = vmul.f32 %v614_v49, %v519_v51 }
 0x346   :  { %v521_v53 = vmul.f32 %v612_v41, %v520_v52 }
 0x348   :  { %522 = vst [vmem:[%s683_s2] sm:$0xf] %v521_v53 }
 0x349   :  { %527 = vsyncpa [#allocation3], 1 }

</bundles_post_ra>
